<compile_context>
chip_gen: v7x
topology: tpu7x:2x2x1
jax: 0.10.0
libtpu: 0.0.40
codegen_flags: <defaults>
</compile_context>

<pallas_src>
import functools

import jax
import jax.numpy as jnp
from jax import lax
from jax.experimental import pallas as pl
from jax.experimental.pallas import tpu as pltpu


# ------------------------------ Pallas kernel --------------------------------
def chan_layer_norm_kernel(x_ref, g_ref, o_ref, *, eps, stable):
    # x_ref: (TB, C, THW)   g_ref: (1, C, THW) lane-dense   o_ref: (TB, C, THW)
    x = x_ref[...].astype(jnp.float32)

    if stable:
        # Matches the module: x = x / x.amax(dim=1, keepdim=True).detach()
        # TODO(synk): no clamp on the channel max (faithful to the reference);
        # a zero/negative max yields inf/nan exactly as in PyTorch.
        x = x / jnp.max(x, axis=1, keepdims=True)

    mean = jnp.mean(x, axis=1, keepdims=True)            # (TB, 1, THW)  XLU
    xc = x - mean                                        # computed once, reused
    var = jnp.mean(xc * xc, axis=1, keepdims=True)       # unbiased=False
    inv_std = lax.rsqrt(var + eps)                       # EUP rsqrt

    o_ref[...] = (xc * inv_std * g_ref[...]).astype(o_ref.dtype)


# ------------------------------ tile heuristic --------------------------------
def _choose_spatial_tile(B, C, HW, tb):
    """Lane tile (multiple of 128) sized for scoped VMEM and >=2 grid steps."""
    target_bytes = 2 * 1024 * 1024                  # fp32 compute copy of x tile
    per_lane = max(1, tb * C * 4)
    thw = max(128, (target_bytes // per_lane) // 128 * 128)
    hw128 = pl.cdiv(HW, 128) * 128
    thw = min(thw, hw128)
    # v7x has 2 TensorCores: never collapse the parallel grid to a single step
    # if we can split the spatial axis instead.
    while (B // tb) * pl.cdiv(hw128, thw) < 2 and thw > 128:
        thw = max(128, (thw // 2) // 128 * 128)
    return thw


# --------------------------------- wrapper ------------------------------------
def chan_layer_norm(x, g, *, eps=1e-5, fp16_eps=1e-3, stable=False,
                    block_b=1):
    """ChanLayerNorm forward.  x: (B, C, H, W), g: (1, C, 1, 1)."""
    B, C, H, W = x.shape
    HW = H * W
    eps_val = eps if x.dtype == jnp.float32 else fp16_eps

    tb = block_b
    assert B % tb == 0, (B, tb)

    # Lane-dense layout: channels on sublanes, flattened spatial on lanes.
    thw = _choose_spatial_tile(B, C, HW, tb)
    HWp = pl.cdiv(HW, thw) * thw                      # pad spatial to tile size
    x3 = x.reshape(B, C, HW)
    if HWp != HW:
        x3 = jnp.pad(x3, ((0, 0), (0, 0), (0, HWp - HW)))

    # Pre-broadcast g to a lane-dense slab (grid-resident, DMA'd once).
    g3 = jnp.broadcast_to(g.reshape(1, C, 1).astype(jnp.float32), (1, C, thw))

    grid = (B // tb, HWp // thw)

    kernel = functools.partial(chan_layer_norm_kernel, eps=eps_val,
                               stable=stable)

    itemsize = jnp.dtype(x.dtype).itemsize
    cost = pl.CostEstimate(
        flops=7 * B * C * HW,
        transcendentals=B * HW,                        # rsqrt per (b, hw) column
        bytes_accessed=2 * B * C * HW * itemsize + C * 4,
    )

    out3 = pl.pallas_call(
        kernel,
        out_shape=jax.ShapeDtypeStruct((B, C, HWp), x.dtype),
        grid=grid,
        in_specs=[
            pl.BlockSpec((tb, C, thw), lambda b, s: (b, 0, s)),   # x
            pl.BlockSpec((1, C, thw), lambda b, s: (0, 0, 0)),    # g (resident)
        ],
        out_specs=pl.BlockSpec((tb, C, thw), lambda b, s: (b, 0, s)),
        compiler_params=pltpu.CompilerParams(
            dimension_semantics=("parallel", "parallel")),        # independent
        cost_estimate=cost,
    )(x3, g3)

    if HWp != HW:
        out3 = out3[:, :, :HW]
    return out3.reshape(B, C, H, W)


# --------------------------- pure-JAX reference -------------------------------
def reference_forward(x, g, *, eps=1e-5, fp16_eps=1e-3, stable=False):
    eps_val = eps if x.dtype == jnp.float32 else fp16_eps
    if stable:
        x = x / jnp.max(x, axis=1, keepdims=True)
    var = jnp.var(x, axis=1, keepdims=True)            # ddof=0 == unbiased=False
    mean = jnp.mean(x, axis=1, keepdims=True)
    return (x - mean) * lax.rsqrt(var + eps_val) * g


# ----------------------------------- main --------------------------------------
if __name__ == "__main__":
    key = jax.random.PRNGKey(0)
    k_x, k_g = jax.random.split(key, 2)

    B, C, H, W = 2, 4, 16, 16                          # x: (2, 4, 16, 16)
    x = jax.random.normal(k_x, (B, C, H, W), jnp.float32)
    # nn.Parameter(torch.ones(1, dim, 1, 1)) -- perturb so the scale matters.
    g = jnp.ones((1, C, 1, 1), jnp.float32) \
        + 0.1 * jax.random.normal(k_g, (1, C, 1, 1), jnp.float32)

    out = chan_layer_norm(x, g)
    out = jax.block_until_ready(out)

    ref = reference_forward(x, g)
    assert out.shape == ref.shape, (out.shape, ref.shape)
    assert jnp.allclose(out, ref, rtol=1e-5, atol=1e-5), \
        float(jnp.max(jnp.abs(out - ref)))

    print("KERNEL_OK")
</pallas_src>

<mosaic_0001>
module attributes {stable_mosaic.version = 11 : i64} {
  func.func @chan_layer_norm_kernel(%arg0: i32, %arg1: i32, %arg2: memref<1x4x256xf32, #tpu.memory_space<vmem>>, %arg3: memref<1x4x256xf32, #tpu.memory_space<vmem>>, %arg4: memref<1x4x256xf32, #tpu.memory_space<vmem>>) attributes {dimension_semantics = [#tpu.dimension_semantics<parallel>, #tpu.dimension_semantics<parallel>], iteration_bounds = array<i64: 2, 1>, scalar_prefetch = 0 : i64, scratch_operands = 0 : i64, tpu.core_type = #tpu.core_type<tc>, window_params = [{transform_indices = @transform_0, window_bounds = array<i64: 1, 4, 256>}, {pipeline_mode = #tpu.pipeline_mode<synchronous>, transform_indices = @transform_1, window_bounds = array<i64: 1, 4, 256>}, {transform_indices = @transform_2, window_bounds = array<i64: 1, 4, 256>}]} {
    %c0 = arith.constant 0 : index
    %c0_0 = arith.constant 0 : index
    %c0_1 = arith.constant 0 : index
    %0 = vector.load %arg2[%c0, %c0_0, %c0_1] : memref<1x4x256xf32, #tpu.memory_space<vmem>>, vector<1x4x256xf32>
    %cst = arith.constant dense<0.000000e+00> : vector<1x256xf32>
    %1 = vector.multi_reduction <add>, %0, %cst [1] : vector<1x4x256xf32> to vector<1x256xf32>
    %2 = vector.shape_cast %1 : vector<1x256xf32> to vector<1x1x256xf32>
    %cst_2 = arith.constant 4.000000e+00 : f32
    %3 = vector.broadcast %cst_2 : f32 to vector<1x1x256xf32>
    %4 = arith.divf %2, %3 : vector<1x1x256xf32>
    %5 = vector.broadcast %4 : vector<1x1x256xf32> to vector<1x4x256xf32>
    %6 = arith.subf %0, %5 : vector<1x4x256xf32>
    %7 = arith.mulf %6, %6 : vector<1x4x256xf32>
    %cst_3 = arith.constant dense<0.000000e+00> : vector<1x256xf32>
    %8 = vector.multi_reduction <add>, %7, %cst_3 [1] : vector<1x4x256xf32> to vector<1x256xf32>
    %9 = vector.shape_cast %8 : vector<1x256xf32> to vector<1x1x256xf32>
    %cst_4 = arith.constant 4.000000e+00 : f32
    %10 = vector.broadcast %cst_4 : f32 to vector<1x1x256xf32>
    %11 = arith.divf %9, %10 : vector<1x1x256xf32>
    %cst_5 = arith.constant 9.99999974E-6 : f32
    %12 = vector.broadcast %cst_5 : f32 to vector<1x1x256xf32>
    %13 = arith.addf %11, %12 : vector<1x1x256xf32>
    %14 = math.rsqrt %13 : vector<1x1x256xf32>
    %15 = vector.broadcast %14 : vector<1x1x256xf32> to vector<1x4x256xf32>
    %16 = arith.mulf %6, %15 : vector<1x4x256xf32>
    %c0_6 = arith.constant 0 : index
    %c0_7 = arith.constant 0 : index
    %c0_8 = arith.constant 0 : index
    %17 = vector.load %arg3[%c0_6, %c0_7, %c0_8] : memref<1x4x256xf32, #tpu.memory_space<vmem>>, vector<1x4x256xf32>
    %18 = arith.mulf %16, %17 : vector<1x4x256xf32>
    %c0_9 = arith.constant 0 : index
    %c0_10 = arith.constant 0 : index
    %c0_11 = arith.constant 0 : index
    %19 = vector.load %arg4[%c0_9, %c0_10, %c0_11] : memref<1x4x256xf32, #tpu.memory_space<vmem>>, vector<1x4x256xf32>
    tpu.vector_store %arg4[%c0_9, %c0_10, %c0_11], %18 {strides = array<i32>} : memref<1x4x256xf32, #tpu.memory_space<vmem>>, vector<1x4x256xf32>,
    return
  }
  func.func @transform_0(%arg0: i32, %arg1: i32) -> (i32, i32, i32) {
    %c0_i32 = arith.constant 0 : i32
    %c0_i32_0 = arith.constant 0 : i32
    return %arg0, %c0_i32, %arg1 : i32, i32, i32
  }
  func.func @transform_1(%arg0: i32, %arg1: i32) -> (i32, i32, i32) {
    %c0_i32 = arith.constant 0 : i32
    %c0_i32_0 = arith.constant 0 : i32
    %c0_i32_1 = arith.constant 0 : i32
    %c0_i32_2 = arith.constant 0 : i32
    return %c0_i32, %c0_i32_0, %c0_i32_1 : i32, i32, i32
  }
  func.func @transform_2(%arg0: i32, %arg1: i32) -> (i32, i32, i32) {
    %c0_i32 = arith.constant 0 : i32
    %c0_i32_0 = arith.constant 0 : i32
    return %arg0, %c0_i32, %arg1 : i32, i32, i32
  }
}

</mosaic_0001>

<bundles_post_ra>
// kernel: tpu_custom_call.1
= control target key start
LH: loop header
LB: loop body
LE: loop exit
PB: predicated region body
PF: predicated region fallthrough
CT: control target
= control target key end

     0   :  { %7 = vsyncpa [#allocation3], 0  ;;  %s848_s0 = inlined_call_operand.hbm [shape: f32[2,4,256], index: 0, kind: input, shape index: {}]   ;;  %s849_s1 = inlined_call_operand.hbm [shape: f32[1,4,256], index: 1, kind: input, shape index: {}]   ;;  %s850_s2 = inlined_call_operand.hbm [shape: f32[2,4,256], index: 2, kind: output, shape index: {}]  }
   0x1   :  { %9 = vsyncpa [#allocation3 + $0x1], 0 }
   0x2   :  { %10 = vsyncpa [#allocation6], 0 }
   0x3   :  { %11 = vsyncpa [#allocation4], 0 }
   0x4   :  { %13 = vsyncpa [#allocation4 + $0x1], 0  ;;  %s624_s9 = smov 0   ;;  %s626_s10 = smov 0  }
   0x5   :  { %s628_s11 = smov 0   ;;  %s630_s12 = smov 0  }
   0x6   :  { %s632_s13 = smov 0   ;;  %s634_s14 = smov 0  }
   0x7 LB: > { %s363_s15 = sadd.s32 4294967295, %s604_s14   ;;  %s364_s16 = sadd.s32 4294967294, %s604_s14   ;;  %s604_s14 = sphi %s634_s14, %s19_s14   ;;  %s600_s13 = sphi %s632_s13, %s875_s13   ;;  %s596_s12 = sphi %s630_s12, %s874_s12   ;;  %s592_s11 = sphi %s628_s11, %s873_s11   ;;  %s588_s10 = sphi %s626_s10, %s872_s10   ;;  %s584_s9 = sphi %s624_s9, %s871_s9  }
   0x8   : > { %p53_p0 = scmp.ne.s32.totalorder %s588_s10, %s584_s9  ;;  %p658_p1 = scmp.eq.s32.totalorder %s363_s15, 0 }
   0x9   : > { %p662_p2 = scmp.eq.s32.totalorder %s363_s15, 1  ;;  %p106_p3 = scmp.eq.s32.totalorder %s364_s16, 1 }
   0xa   : > { %s855_s17 = scalar_select %p658_p1, 1, 0 }
   0xb   : > { %s856_s18 = scalar_select %p662_p2, 1, 0 }
   0xc   : > { %p668_p4 = por %p658_p1, %p53_p0  ;;  %p365_p5 = scmp.ge.s32.totalorder %s604_s14, 1 }
   0xd   : > { %p673_p6 = por %p106_p3, %p53_p0  ;;  %p113_p7 = scmp.lt.s32.totalorder %s604_s14, 3 }
   0xe   : > { %s857_s19 = scalar_select %p668_p4, 1, 0 }
   0xf   : > { %s858_s20 = scalar_select %p673_p6, 1, 0 }
  0x10   : > { %p678_p8 = pnand %p365_p5, %p113_p7  ;;  %s606_s22 = smov [#allocation5]  }
  0x11   : > { %s126_s23 = sshll.u32 %s606_s22, 4  ;;  %s31_s25 = sadd.s32 1, %s600_s13  ;;  %s127_s23 = int_to_ptr.vmem [resolvable:$true] %s126_s23 }
  0x12   : > { %s859_s21 = scalar_select %p678_p8, 1, 0 }
  0x13   : > { %p390_p10 = pneg %p678_p8  ;;  %s40_s26 = sadd.s32 1, %s592_s11 }
  0x14   : > { %p693_p12 = scmp.ge.s32.totalorder %s31_s25, 2  ;;  %s460_s30 = scalar_lea.hbm %s849_s1, 128 }
  0x15   : > { %p687_p11 = pnand %p390_p10, %p658_p1  ;;  %p461_p13 = scmp.ne.s32.totalorder %s849_s1, %s460_s30 }
  0x16   : > { %s861_s27 = scalar_select %p693_p12, 1, 0 }
  0x17   : > { %p462_p0 = pneg %p687_p11  ;;  %p467_p7 = scmp.lt.u32.totalorder %s460_s30, %s849_s1 }
  0x19   : > { %p463_p3 = pnand %p462_p0, %p461_p13 }
  0x1b   : > { %p464_p5 = pneg %p463_p3 }
  0x1d   : > { %p469_p10 = pnand %p467_p7, %p464_p5 }
  0x1f   : > { %472 = shalt.err (!%p469_p10)
}
  0x20   : > { %s473_s7 = scalar_lea.vmem %s127_s23, 128  ;;  %p481_p4 = scmp.lt.s32.totalorder %s127_s23, %s127_s23 }
  0x21   : > { %p474_p9 = scmp.ne.s32.totalorder %s127_s23, %s473_s7  ;;  %p482_p8 = scmp.lt.s32.totalorder %s473_s7, %s473_s7 }
  0x23   : > { %p476_p6 = pnand %p474_p9, %p462_p0  ;;  %p483_p2 = por %p482_p8, %p481_p4 }
  0x25   : > { %p477_p1 = pneg %p476_p6 }
  0x27   : > { %p484_p12 = pnand %p483_p2, %p477_p1 }
  0x29   : > { %487 = shalt.err (!%p484_p12)
}
  0x2a   : > { %393 = dma.hbm_to_vmem [thread:$0]  (!%p687_p11), %s849_s1, 128, %s127_s23, [#allocation6]  }
  0x2b   : > { %p862_p4 = scmp.ne.s32.totalorder %s861_s27, 0  ;;  %p47_p1 = scmp.ne.s32.totalorder %s592_s11, %s588_s10 }
  0x2c   : > { %p48_p2 = scmp.eq.s32.totalorder %s604_s14, 0  ;;  %p403_p6 = scmp.lt.s32.totalorder %s604_s14, 2 }
  0x2d   : > { %s877_s25 = smov (%p862_p4, %s31_s25), 0  ;;  %p863_p12 = scmp.ne.s32.totalorder %s856_s18, 0 }
  0x2e   : > { %s35_s16 = ssub.s32 %s600_s13, %s877_s25  ;;  %p49_p9 = por %p48_p2, %p47_p1 }
  0x2f   : > { %p38_p8 = scmp.eq.s32.totalorder %s35_s16, 0  ;;  %p725_p13 = por %p863_p12, %p47_p1 }
  0x30   : > { %s137_s24 = sand.u32 1, %s592_s11   ;;  %s380_s27 = sshll.u32 %s600_s13, 7 }
  0x31   : > { %s733_s28 = scalar_select %p38_p8, %s592_s11, %s40_s26  }
  0x32   : > { %s368_s23 = sshll.u32 %s137_s24, 3  ;;  %s739_s3 = scalar_lea.hbm %s848_s0, %s380_s27 }
  0x33   : > { %s141_s18 = scalar_lea.vmem [#allocation2], %s368_s23  ;;  %p743_p11 = pnand %p403_p6, %p49_p9 }
  0x34   : > { %s151_s4 = sshll.u32 %s141_s18, 4  ;;  %s138_s26 = scalar_lea.sflag [#allocation3], %s137_s24  ;;  %s741_s4 = int_to_ptr.vmem [resolvable:$true] %s151_s4 }
  0x35   : > { %s488_s6 = scalar_lea.hbm %s739_s3, 128  ;;  %p490_p3 = pneg %p743_p11 }
  0x36   : > { %p489_p0 = scmp.ne.s32.totalorder %s739_s3, %s488_s6  ;;  %s493_s15 = scalar_lea.hbm %s848_s0, 256 }
  0x37   : > { %p494_p10 = scmp.lt.u32.totalorder %s739_s3, %s848_s0  ;;  %p495_p4 = scmp.lt.u32.totalorder %s493_s15, %s488_s6 }
  0x38   : > { %p491_p5 = pnand %p490_p3, %p489_p0  ;;  %p497_p2 = scmp.lt.u32.totalorder %s488_s6, %s739_s3 }
  0x39   : > { %p496_p1 = por %p495_p4, %p494_p10 }
  0x3a   : > { %p492_p7 = pneg %p491_p5 }
  0x3b   : > { %p498_p6 = por %p497_p2, %p496_p1 }
  0x3d   : > { %p499_p8 = pnand %p498_p6, %p492_p7 }
  0x3f   : > { %502 = shalt.err (!%p499_p8)
}
  0x40   : > { %s503_s24 = scalar_lea.vmem %s741_s4, 128  ;;  %s607_s27 = smov [#allocation2]  }
  0x41   : > { %p504_p9 = scmp.ne.s32.totalorder %s741_s4, %s503_s24  ;;  %s508_s29 = sshll.u32 %s607_s27, 4  ;;  %s509_s29 = int_to_ptr.vmem [resolvable:$false] %s508_s29 }
  0x42   : > { %s510_s30 = scalar_lea.vmem %s509_s29, 256  ;;  %p511_p5 = scmp.lt.s32.totalorder %s741_s4, %s509_s29 }
  0x43   : > { %p506_p12 = pnand %p504_p9, %p490_p3  ;;  %p512_p10 = scmp.lt.s32.totalorder %s510_s30, %s503_s24 }
  0x45   : > { %p507_p0 = pneg %p506_p12  ;;  %p513_p4 = por %p512_p10, %p511_p5 }
  0x47   : > { %p514_p1 = pnand %p513_p4, %p507_p0 }
  0x49   : > { %517 = shalt.err (!%p514_p1)
}
  0x4a   : > { %397 = dma.hbm_to_vmem [thread:$0]  (!%p743_p11), %s739_s3, 128, %s741_s4, %s138_s26  }
  0x4b   : > { %p866_p7 = scmp.ne.s32.totalorder %s859_s21, 0 }
  0x4c   : > { %s775_s18 = sand.u32 (!%p866_p7), 1, %s588_s10   ;;  %p867_p3 = scmp.ne.s32.totalorder (!%p866_p7), %s857_s19, 0 }
  0x4d   : > { %160 = sbr.rel (%p866_p7) target bundleno = 162 (0xa2), region = 28  ;;  %s372_s6 = sshll.u32 (!%p866_p7), %s775_s18, 3 }
  0x4e   : > { %s163_s7 = scalar_lea.sflag (!%p866_p7), [#allocation3], %s775_s18  ;;  %s166_s8 = scalar_lea.vmem (!%p866_p7), [#allocation2], %s372_s6 }
  0x54   : > { %571 = dma.done.wait (%p867_p3), %s163_s7, 128  }
  0x55   : > { %573 = vsyncadd (%p867_p3), %s163_s7, 4294967168  ;;  %p868_p11 = scmp.ne.s32.totalorder %s855_s17, 0 }
  0x57   : > { %575 = dma.done.wait (%p868_p11), [#allocation6], 128  }
  0x58   : > { %577 = vsyncadd (%p868_p11), [#allocation6], 4294967168  ;;  %vm197_vm0 = vcmask 1043456   ;;  %v193_v0 = vld [vmem:[%s166_s8] sm:$0xff]  ;;  %v249_v43 = vld [vmem:[#allocation5] sm:$0xff]  ;;  %s190_s17 = scalar_lea.vmem [#allocation7], %s372_s6 }
  0x59   : > { %v195_v1 = vcombine.high %v193_v0, %v193_v0  ;;  %v198_v2 = vsel %vm197_vm0, %v193_v0, 0.0  ;;  %s269_s19 = sshll.u32 %s190_s17, 4  ;;  %s381_s21 = sshll.u32 %s596_s12, 7  ;;  %s796_s19 = int_to_ptr.vmem [resolvable:$true] %s269_s19 }
  0x5a   : > { %v199_v3 = vrot.slane %v198_v2, 4  ;;  %s801_s5 = scalar_lea.hbm %s850_s2, %s381_s21  ;;  %s253_s26 = scalar_lea.sflag [#allocation4], %s775_s18 }
  0x5b   : > { %v205_v4 = vsel %vm197_vm0, %v195_v1, 0.0  ;;  %s518_s15 = scalar_lea.vmem %s796_s19, 128  ;;  %s608_s12 = smov [#allocation7]  }
  0x5c   : > { %v200_v5 = vadd.f32 %v199_v3, %v198_v2  ;;  %v206_v6 = vrot.slane %v205_v4, 4  ;;  %p519_p2 = scmp.ne.s32.totalorder %s796_s19, %s518_s15  ;;  %s522_s16 = sshll.u32 %s608_s12, 4  ;;  %s523_s16 = int_to_ptr.vmem [resolvable:$false] %s522_s16 }
  0x5d   : > { %s524_s23 = scalar_lea.vmem %s523_s16, 256  ;;  %p525_p9 = scmp.lt.s32.totalorder %s796_s19, %s523_s16 }
  0x5e   : > { %v201_v7 = vrot.slane %v200_v5, 2  ;;  %v207_v8 = vadd.f32 %v206_v6, %v205_v4  ;;  %p520_p6 = pnand %p519_p2, %p725_p13  ;;  %p526_p12 = scmp.lt.s32.totalorder %s524_s23, %s518_s15 }
  0x60   : > { %v202_v9 = vadd.f32 %v201_v7, %v200_v5  ;;  %v208_v10 = vrot.slane %v207_v8, 2  ;;  %p521_p8 = pneg %p520_p6  ;;  %p527_p0 = por %p526_p12, %p525_p9 }
  0x62   : > { %v203_v11 = vrot.slane %v202_v9, 1  ;;  %v209_v12 = vadd.f32 %v208_v10, %v207_v8  ;;  %p528_p5 = pnand %p527_p0, %p521_p8 }
  0x64   : > { %v204_v13 = vadd.f32 %v203_v11, %v202_v9  ;;  %v210_v14 = vrot.slane %v209_v12, 1 }
  0x66   : > { %v211_v15 = vadd.f32 %v210_v14, %v209_v12  ;;  %v213_v16 = vmul.f32 0.25, %v204_v13 }
  0x68   : > { %v214_v17 = vmul.f32 0.25, %v211_v15 }
  0x6a   : > { %v217_v18 = vcombine.low %v213_v16, %v214_v17 }
  0x6c   : > { %v219_v19 = vsub.f32 %v193_v0, %v217_v18 }
  0x6e   : > { %v220_v20 = vmul.f32 %v219_v19, %v219_v19 }
  0x70   : > { %v222_v21 = vcombine.high %v220_v20, %v220_v20  ;;  %v224_v22 = vsel %vm197_vm0, %v220_v20, 0.0 }
  0x71   : > { %v225_v23 = vrot.slane %v224_v22, 4 }
  0x72   : > { %v231_v24 = vsel %vm197_vm0, %v222_v21, 0.0 }
  0x73   : > { %v226_v25 = vadd.f32 %v225_v23, %v224_v22  ;;  %v232_v26 = vrot.slane %v231_v24, 4 }
  0x75   : > { %v227_v27 = vrot.slane %v226_v25, 2  ;;  %v233_v28 = vadd.f32 %v232_v26, %v231_v24 }
  0x77   : > { %v228_v29 = vadd.f32 %v227_v27, %v226_v25  ;;  %v234_v30 = vrot.slane %v233_v28, 2 }
  0x79   : > { %v229_v31 = vrot.slane %v228_v29, 1  ;;  %v235_v32 = vadd.f32 %v234_v30, %v233_v28 }
  0x7b   : > { %v230_v33 = vadd.f32 %v229_v31, %v228_v29  ;;  %v236_v34 = vrot.slane %v235_v32, 1 }
  0x7d   : > { %v237_v35 = vadd.f32 %v236_v34, %v235_v32  ;;  %v238_v36 = vmul.f32 0.25, %v230_v33 }
  0x7f   : > { %v239_v37 = vmul.f32 0.25, %v237_v35  ;;  %v240_v38 = vadd.f32 1e-05, %v238_v36 }
  0x81   : > { %v241_v39 = vadd.f32 1e-05, %v239_v37  ;;  %456 = vrsqrt.f32 %v240_v38 }
  0x83   : > { %458 = vrsqrt.f32 %v241_v39 }
  0x8b   : > { %v457_v40 = vpop.eup %456 }
  0x8d   : > { %v459_v41 = vpop.eup %458 }
  0x8e   : > { %v246_v42 = vcombine.low %v457_v40, %v459_v41 }
  0x90   : > { %v248_v44 = vmul.f32 %v246_v42, %v219_v19 }
  0x92   : > { %v250_v45 = vmul.f32 %v249_v43, %v248_v44 }
  0x94   : > { %251 = vst [vmem:[%s190_s17] sm:$0xff] %v250_v45 }
  0x95   : > { %531 = shalt.err (!%p528_p5)
}
  0x96   : > { %s532_s24 = scalar_lea.hbm %s801_s5, 128  ;;  %s536_s30 = scalar_lea.hbm %s850_s2, 256 }
  0x97   : > { %p533_p10 = scmp.ne.s32.totalorder %s801_s5, %s532_s24  ;;  %p537_p7 = scmp.lt.u32.totalorder %s801_s5, %s850_s2 }
  0x98   : > { %p538_p3 = scmp.lt.u32.totalorder %s536_s30, %s532_s24  ;;  %p540_p2 = scmp.lt.u32.totalorder %s532_s24, %s801_s5 }
  0x99   : > { %p534_p4 = pnand %p533_p10, %p725_p13 }
  0x9a   : > { %p539_p11 = por %p538_p3, %p537_p7 }
  0x9b   : > { %p535_p1 = pneg %p534_p4 }
  0x9c   : > { %p541_p6 = por %p540_p2, %p539_p11 }
  0x9e   : > { %p542_p8 = pnand %p541_p6, %p535_p1 }
  0xa0   : > { %545 = shalt.err (!%p542_p8)
}
  0xa1   : > { %388 = dma.vmem_to_hbm [thread:$0]  (%p725_p13), %s796_s19, 128, %s801_s5, %s253_s26  }
  0xa2 PF: > { %s281_s7 = sand.u32 1, %s584_s9   ;;  %p869_p9 = scmp.ne.s32.totalorder %s858_s20, 0 }
  0xa3   : > { %p870_p12 = scmp.ge.s32.totalorder %s604_s14, 2  ;;  %s282_s8 = scalar_lea.sflag [#allocation4], %s281_s7 }
  0xa5   : > { %p399_p0 = pnand %p870_p12, %p869_p9 }
  0xa7   : > { %579 = dma.done.wait (!%p399_p0), %s282_s8, 128  }
  0xa8   : > { %581 = vsyncadd (!%p399_p0), %s282_s8, 4294967168  ;;  %s19_s14 = sadd.s32 1, %s604_s14   ;;  %s871_s9 = smov %s588_s10 }
  0xa9   : > { %p16_p5 = scmp.ge.s32.totalorder %s19_s14, 4   ;;  %s872_s10 = smov %s592_s11 }
  0xaa   : > { %s873_s11 = smov %s733_s28  ;;  %s874_s12 = smov %s600_s13 }
  0xab   : > { %s875_s13 = smov %s877_s25  ;;  %18 = sbr.rel (!%p16_p5) target bundleno = 7 (0x7), region = 77 }
  0xb2   :  { %287 = vsyncpa [#allocation3], 1 }
  0xb3   :  { %289 = vsyncpa [#allocation3 + $0x1], 1 }
  0xb4   :  { %290 = vsyncpa [#allocation6], 1 }
  0xb5   :  { %291 = vsyncpa [#allocation4], 1 }
  0xb6   :  { %293 = vsyncpa [#allocation4 + $0x1], 1 }

</bundles_post_ra>
